<compile_context>
chip_gen: v5e
topology: v5e:2x2
jax: 0.10.0
libtpu: 0.0.40
codegen_flags: <defaults>
</compile_context>

<pallas_src>
import functools

import jax
import jax.numpy as jnp
from jax.experimental import pallas as pl
from jax.experimental.pallas import tpu as pltpu

EPS = 1e-5


# --------------------------------------------------------------------------
# host-side weight preprocessing (conv-as-matmul in the (N*H, W*C) layout)
# --------------------------------------------------------------------------
def _conv3x3_to_matmul_weights(ker, W):
    """ker: (3, 3, Ci, Co) HWIO -> (3*W*Ci, W*Co) block-Toeplitz matrix so that
    conv3x3(pad=1, stride=1) becomes  out2d = taps(x2d) @ bigW  with
    x2d laid out as (N*H, W*Ci) and out2d as (N*H, W*Co)."""
    KH, KW, Ci, Co = ker.shape
    wi = jnp.arange(W)[:, None]                    # input (tap) w position
    wo = jnp.arange(W)[None, :]                    # output w position
    dw = wi - wo + (KW // 2)                       # kernel tap index along width
    valid = ((dw >= 0) & (dw < KW)).astype(ker.dtype)[:, :, None, None]
    dw = jnp.clip(dw, 0, KW - 1)
    blocks = []
    for dh in range(KH):
        blk = ker[dh][dw] * valid                  # (W, W, Ci, Co)
        blocks.append(jnp.transpose(blk, (0, 2, 1, 3)).reshape(W * Ci, W * Co))
    return jnp.concatenate(blocks, axis=0)         # (3*W*Ci, W*Co)


def _tile_lanes(p, W):
    """Per-channel vector (C,) or (1,C) -> (1, W*C) matching the lane layout."""
    return jnp.tile(jnp.asarray(p, jnp.float32).reshape(1, -1), (1, W))


# --------------------------------------------------------------------------
# kernel
# --------------------------------------------------------------------------
def _channel_allreduce(v, W, C):
    """v: (1, W*C) column sums -> (1, W*C) where every lane holds its channel's
    total over all w groups (result is already broadcast back to the layout)."""
    if W & (W - 1) == 0:                           # power-of-two W: log2(W) rolls
        s = C
        while s < W * C:
            v = v + pltpu.roll(v, shift=s, axis=1)   # cyclic => direction-agnostic
            s *= 2
        return v
    # general fallback (tiny arrays)
    per_ch = jnp.sum(v.reshape(W, C), axis=0, keepdims=True)    # (1, C)
    return jnp.tile(per_ch, (1, W))


def _make_kernel(N, H, W, Cin, Cout, use_proj):
    NH = N * H
    inv_count = 1.0 / float(N * H * W)

    def kernel(*refs):
        if use_proj:
            (x_ref, mup_ref, mdn_ref, w1_ref, g1_ref, b1_ref,
             w2_ref, g2_ref, b2_ref, ws_ref, gs_ref, bs_ref, out_ref) = refs
        else:
            (x_ref, mup_ref, mdn_ref, w1_ref, g1_ref, b1_ref,
             w2_ref, g2_ref, b2_ref, out_ref) = refs

        mask_up = mup_ref[...]      # (NH, 1): 1.0 where h > 0     (tap h-1 valid)
        mask_dn = mdn_ref[...]      # (NH, 1): 1.0 where h < H-1   (tap h+1 valid)

        def taps(v):
            # v: (NH, W*C) -> (NH, 3*W*C): rows shifted by dh-1 in {-1,0,+1},
            # out-of-image rows zeroed.  dw taps live inside the Toeplitz weights.
            z = jnp.zeros((1, v.shape[1]), v.dtype)
            up = jnp.concatenate([z, v[:-1, :]], axis=0) * mask_up   # T[r] = v[r-1]
            dn = jnp.concatenate([v[1:, :], z], axis=0) * mask_dn    # T[r] = v[r+1]
            return jnp.concatenate([up, v, dn], axis=1)

        def bn_train(a, g_ref, b_ref):
            # a: (NH, W*Cout); single-pass batch stats (sum & sum of squares).
            s1 = _channel_allreduce(jnp.sum(a, axis=0, keepdims=True), W, Cout)
            s2 = _channel_allreduce(jnp.sum(a * a, axis=0, keepdims=True), W, Cout)
            mu = s1 * inv_count
            var = s2 * inv_count - mu * mu
            return (a - mu) * (g_ref[...] * jax.lax.rsqrt(var + EPS)) + b_ref[...]

        x = x_ref[...]                                             # (NH, W*Cin)

        # conv1 (3x3, pad=1): one matmul, K = 3*W*Cin, lane-dense output.
        a1 = jnp.dot(taps(x), w1_ref[...], preferred_element_type=jnp.float32)
        y1 = jnp.maximum(bn_train(a1, g1_ref, b1_ref), 0.0)

        # conv2 (3x3, pad=1): one matmul, K = 3*W*Cout.
        a2 = jnp.dot(taps(y1), w2_ref[...], preferred_element_type=jnp.float32)
        main = bn_train(a2, g2_ref, b2_ref)

        # shortcut
        if use_proj:
            sc = jnp.dot(x, ws_ref[...], preferred_element_type=jnp.float32)
            sc = bn_train(sc, gs_ref, bs_ref)
        else:
            sc = x                                  # identity (Cin == Cout)

        out_ref[...] = jnp.maximum(main + sc, 0.0).astype(out_ref.dtype)

    return kernel


# --------------------------------------------------------------------------
# public wrapper (NCHW in / NCHW out, PyTorch convention)
# --------------------------------------------------------------------------
def residual_block_pallas(x_nchw, params, *, stride=1):
    """x_nchw: (N, Cin, H, W) float32.  Returns (N, Cout, H, W) float32."""
    if stride != 1:
        # TODO(synk): strided (downsampling) conv path not implemented.
        raise NotImplementedError("stride != 1 not implemented in this kernel")

    N, Cin, H, W = x_nchw.shape
    Cout = params["w1"].shape[-1]
    use_proj = (Cin != Cout)
    NH = N * H

    # NCHW -> lane-dense (N*H, W*Cin) working layout (no spatial padding).
    x2d = (jnp.transpose(x_nchw, (0, 2, 3, 1))
           .reshape(NH, W * Cin).astype(jnp.float32))

    # h-boundary validity masks for the row-shifted (dh) taps.
    h_of_row = jnp.arange(NH, dtype=jnp.int32) % H
    mask_up = (h_of_row > 0).astype(jnp.float32).reshape(NH, 1)
    mask_dn = (h_of_row < H - 1).astype(jnp.float32).reshape(NH, 1)

    bw1 = _conv3x3_to_matmul_weights(params["w1"].astype(jnp.float32), W)
    bw2 = _conv3x3_to_matmul_weights(params["w2"].astype(jnp.float32), W)
    g1, b1 = _tile_lanes(params["g1"], W), _tile_lanes(params["b1"], W)
    g2, b2 = _tile_lanes(params["g2"], W), _tile_lanes(params["b2"], W)

    args = [x2d, mask_up, mask_dn, bw1, g1, b1, bw2, g2, b2]
    if use_proj:
        # 1x1 projection as a block-diagonal (W*Cin, W*Cout) matmul.
        bws = jnp.kron(jnp.eye(W, dtype=jnp.float32),
                       params["ws"].astype(jnp.float32))
        args += [bws, _tile_lanes(params["gs"], W), _tile_lanes(params["bs"], W)]

    flops = (2 * NH * (3 * W * Cin) * (W * Cout)
             + 2 * NH * (3 * W * Cout) * (W * Cout))
    if use_proj:
        flops += 2 * NH * (W * Cin) * (W * Cout)
    bytes_accessed = 4 * (sum(int(a.size) for a in args) + NH * W * Cout)
    cost = pl.CostEstimate(flops=flops,
                           transcendentals=(3 if use_proj else 2) * W * Cout,
                           bytes_accessed=bytes_accessed)

    vmem = pl.BlockSpec(memory_space=pltpu.MemorySpace.VMEM)
    kernel = _make_kernel(N, H, W, Cin, Cout, use_proj)

    # TODO(synk): for real ResNet sizes, tile over N / H-stripes with a
    # ("parallel", ...) grid + two-phase BN so the working set fits v7x's
    # 64 MiB VMEM and both v7x TensorCores are used; at this toy size a single
    # grid-less program (everything resident, < 1 MiB) is fastest.
    out2d = pl.pallas_call(
        kernel,
        out_shape=jax.ShapeDtypeStruct((NH, W * Cout), jnp.float32),
        in_specs=[vmem] * len(args),
        out_specs=vmem,
        cost_estimate=cost,
    )(*args)

    return jnp.transpose(out2d.reshape(N, H, W, Cout), (0, 3, 1, 2))


# ----------------------------- pure-JAX reference -----------------------------
def residual_block_ref(x_nchw, params, *, stride=1):
    w1, g1, b1, w2, g2, b2 = (params["w1"], params["g1"], params["b1"],
                              params["w2"], params["g2"], params["b2"])
    x = jnp.transpose(x_nchw, (0, 2, 3, 1)).astype(jnp.float32)
    Cin, Cout = w1.shape[2], w1.shape[3]
    use_proj = (Cin != Cout)

    def conv(x, w, pad):
        return jax.lax.conv_general_dilated(
            x, w, (stride, stride), pad,
            dimension_numbers=("NHWC", "HWIO", "NHWC"),
            precision=jax.lax.Precision.HIGHEST)

    def bn_train(x, g, b):
        mu = jnp.mean(x, axis=(0, 1, 2), keepdims=True)
        var = jnp.mean((x - mu) ** 2, axis=(0, 1, 2), keepdims=True)
        return (x - mu) * jax.lax.rsqrt(var + EPS) * g.reshape(1, 1, 1, -1) \
            + b.reshape(1, 1, 1, -1)

    out = jax.nn.relu(bn_train(conv(x, w1, [(1, 1), (1, 1)]), g1, b1))
    out = bn_train(conv(out, w2, [(1, 1), (1, 1)]), g2, b2)
    if use_proj:
        sc = conv(x, params["ws"][None, None], [(0, 0), (0, 0)])
        sc = bn_train(sc, params["gs"], params["bs"])
    else:
        sc = x
    out = jax.nn.relu(out + sc)
    return jnp.transpose(out, (0, 3, 1, 2))


def init_params(key, in_channels, out_channels):
    ks = jax.random.split(key, 9)
    p = {
        "w1": 0.1 * jax.random.normal(ks[0], (3, 3, in_channels, out_channels), jnp.float32),
        "g1": (1.0 + 0.1 * jax.random.normal(ks[1], (1, out_channels), jnp.float32)),
        "b1": 0.1 * jax.random.normal(ks[2], (1, out_channels), jnp.float32),
        "w2": 0.1 * jax.random.normal(ks[3], (3, 3, out_channels, out_channels), jnp.float32),
        "g2": (1.0 + 0.1 * jax.random.normal(ks[4], (1, out_channels), jnp.float32)),
        "b2": 0.1 * jax.random.normal(ks[5], (1, out_channels), jnp.float32),
    }
    if in_channels != out_channels:
        p["ws"] = 0.1 * jax.random.normal(ks[6], (in_channels, out_channels), jnp.float32)
        p["gs"] = (1.0 + 0.1 * jax.random.normal(ks[7], (1, out_channels), jnp.float32))
        p["bs"] = 0.1 * jax.random.normal(ks[8], (1, out_channels), jnp.float32)
    return p


if __name__ == "__main__":
    key = jax.random.PRNGKey(0)
    run = jax.jit(functools.partial(residual_block_pallas, stride=1))

    # 1) projection-shortcut path (Cin != Cout)
    k_x, k_p, k_x2, k_p2 = jax.random.split(key, 4)
    N, Cin, Cout, HW = 2, 4, 8, 16
    x = jax.random.normal(k_x, (N, Cin, HW, HW), jnp.float32)     # NCHW like PyTorch
    params = init_params(k_p, Cin, Cout)
    out = jax.block_until_ready(run(x, params))
    ref = residual_block_ref(x, params, stride=1)
    assert out.shape == (N, Cout, HW, HW), out.shape
    assert jnp.allclose(out, ref, atol=5e-3, rtol=5e-3), \
        float(jnp.max(jnp.abs(out - ref)))

    # 2) identity-shortcut path (Cin == Cout)
    x2 = jax.random.normal(k_x2, (N, Cout, HW, HW), jnp.float32)
    params2 = init_params(k_p2, Cout, Cout)
    out2 = jax.block_until_ready(run(x2, params2))
    ref2 = residual_block_ref(x2, params2, stride=1)
    assert out2.shape == (N, Cout, HW, HW), out2.shape
    assert jnp.allclose(out2, ref2, atol=5e-3, rtol=5e-3), \
        float(jnp.max(jnp.abs(out2 - ref2)))

    print("KERNEL_OK")
</pallas_src>

<mosaic_0001>
module attributes {stable_mosaic.version = 11 : i64} {
  func.func @kernel(%arg0: memref<32x64xf32, #tpu.memory_space<vmem>>, %arg1: memref<32x1xf32, #tpu.memory_space<vmem>>, %arg2: memref<32x1xf32, #tpu.memory_space<vmem>>, %arg3: memref<192x128xf32, #tpu.memory_space<vmem>>, %arg4: memref<1x128xf32, #tpu.memory_space<vmem>>, %arg5: memref<1x128xf32, #tpu.memory_space<vmem>>, %arg6: memref<384x128xf32, #tpu.memory_space<vmem>>, %arg7: memref<1x128xf32, #tpu.memory_space<vmem>>, %arg8: memref<1x128xf32, #tpu.memory_space<vmem>>, %arg9: memref<64x128xf32, #tpu.memory_space<vmem>>, %arg10: memref<1x128xf32, #tpu.memory_space<vmem>>, %arg11: memref<1x128xf32, #tpu.memory_space<vmem>>, %arg12: memref<32x128xf32, #tpu.memory_space<vmem>>) attributes {dimension_semantics = [], scalar_prefetch = 0 : i64, scratch_operands = 0 : i64, tpu.core_type = #tpu.core_type<tc>} {
    %c0 = arith.constant 0 : index
    %c0_0 = arith.constant 0 : index
    %0 = vector.load %arg1[%c0, %c0_0] : memref<32x1xf32, #tpu.memory_space<vmem>>, vector<32x1xf32>
    %c0_1 = arith.constant 0 : index
    %c0_2 = arith.constant 0 : index
    %1 = vector.load %arg2[%c0_1, %c0_2] : memref<32x1xf32, #tpu.memory_space<vmem>>, vector<32x1xf32>
    %c0_3 = arith.constant 0 : index
    %c0_4 = arith.constant 0 : index
    %2 = vector.load %arg0[%c0_3, %c0_4] : memref<32x64xf32, #tpu.memory_space<vmem>>, vector<32x64xf32>
    %cst = arith.constant 0.000000e+00 : f32
    %3 = vector.broadcast %cst : f32 to vector<1x64xf32>
    %4 = vector.extract_strided_slice %2 {offsets = [0, 0], sizes = [31, 64], strides = [1, 1]} : vector<32x64xf32> to vector<31x64xf32>
    %5 = tpu.concatenate %3, %4 in 0 : vector<1x64xf32>, vector<31x64xf32> -> vector<32x64xf32>
    %6 = vector.broadcast %0 : vector<32x1xf32> to vector<32x64xf32>
    %7 = arith.mulf %5, %6 : vector<32x64xf32>
    %8 = vector.extract_strided_slice %2 {offsets = [1, 0], sizes = [31, 64], strides = [1, 1]} : vector<32x64xf32> to vector<31x64xf32>
    %9 = tpu.concatenate %8, %3 in 0 : vector<31x64xf32>, vector<1x64xf32> -> vector<32x64xf32>
    %10 = vector.broadcast %1 : vector<32x1xf32> to vector<32x64xf32>
    %11 = arith.mulf %9, %10 : vector<32x64xf32>
    %12 = tpu.concatenate %7, %2, %11 in 1 : vector<32x64xf32>, vector<32x64xf32>, vector<32x64xf32> -> vector<32x192xf32>
    %c0_5 = arith.constant 0 : index
    %c0_6 = arith.constant 0 : index
    %13 = vector.load %arg3[%c0_5, %c0_6] : memref<192x128xf32, #tpu.memory_space<vmem>>, vector<192x128xf32>
    %cst_7 = arith.constant dense<0.000000e+00> : vector<32x128xf32>
    %14 = tpu.matmul %12, %13, %cst_7 {dimension_numbers = #tpu.dot_dimension_numbers<[1], [0], [0], [1], [0, 0, 1, 1], [], []>} : vector<32x192xf32>, vector<192x128xf32>, vector<32x128xf32> -> vector<32x128xf32>
    %cst_8 = arith.constant dense<0.000000e+00> : vector<128xf32>
    %15 = vector.multi_reduction <add>, %14, %cst_8 [0] : vector<32x128xf32> to vector<128xf32>
    %16 = vector.shape_cast %15 : vector<128xf32> to vector<1x128xf32>
    %c8_i32 = arith.constant 8 : i32
    %17 = tpu.dynamic_rotate %16 by %c8_i32 dim 1 : vector<1x128xf32>, i32 -> vector<1x128xf32>
    %18 = arith.addf %16, %17 : vector<1x128xf32>
    %c16_i32 = arith.constant 16 : i32
    %19 = tpu.dynamic_rotate %18 by %c16_i32 dim 1 : vector<1x128xf32>, i32 -> vector<1x128xf32>
    %20 = arith.addf %18, %19 : vector<1x128xf32>
    %c32_i32 = arith.constant 32 : i32
    %21 = tpu.dynamic_rotate %20 by %c32_i32 dim 1 : vector<1x128xf32>, i32 -> vector<1x128xf32>
    %22 = arith.addf %20, %21 : vector<1x128xf32>
    %c64_i32 = arith.constant 64 : i32
    %23 = tpu.dynamic_rotate %22 by %c64_i32 dim 1 : vector<1x128xf32>, i32 -> vector<1x128xf32>
    %24 = arith.addf %22, %23 : vector<1x128xf32>
    %25 = arith.mulf %14, %14 : vector<32x128xf32>
    %cst_9 = arith.constant dense<0.000000e+00> : vector<128xf32>
    %26 = vector.multi_reduction <add>, %25, %cst_9 [0] : vector<32x128xf32> to vector<128xf32>
    %27 = vector.shape_cast %26 : vector<128xf32> to vector<1x128xf32>
    %c8_i32_10 = arith.constant 8 : i32
    %28 = tpu.dynamic_rotate %27 by %c8_i32_10 dim 1 : vector<1x128xf32>, i32 -> vector<1x128xf32>
    %29 = arith.addf %27, %28 : vector<1x128xf32>
    %c16_i32_11 = arith.constant 16 : i32
    %30 = tpu.dynamic_rotate %29 by %c16_i32_11 dim 1 : vector<1x128xf32>, i32 -> vector<1x128xf32>
    %31 = arith.addf %29, %30 : vector<1x128xf32>
    %c32_i32_12 = arith.constant 32 : i32
    %32 = tpu.dynamic_rotate %31 by %c32_i32_12 dim 1 : vector<1x128xf32>, i32 -> vector<1x128xf32>
    %33 = arith.addf %31, %32 : vector<1x128xf32>
    %c64_i32_13 = arith.constant 64 : i32
    %34 = tpu.dynamic_rotate %33 by %c64_i32_13 dim 1 : vector<1x128xf32>, i32 -> vector<1x128xf32>
    %35 = arith.addf %33, %34 : vector<1x128xf32>
    %cst_14 = arith.constant 0.001953125 : f32
    %36 = vector.broadcast %cst_14 : f32 to vector<1x128xf32>
    %37 = arith.mulf %24, %36 : vector<1x128xf32>
    %cst_15 = arith.constant 0.001953125 : f32
    %38 = vector.broadcast %cst_15 : f32 to vector<1x128xf32>
    %39 = arith.mulf %35, %38 : vector<1x128xf32>
    %40 = arith.mulf %37, %37 : vector<1x128xf32>
    %41 = arith.subf %39, %40 : vector<1x128xf32>
    %42 = vector.broadcast %37 : vector<1x128xf32> to vector<32x128xf32>
    %43 = arith.subf %14, %42 : vector<32x128xf32>
    %c0_16 = arith.constant 0 : index
    %c0_17 = arith.constant 0 : index
    %44 = vector.load %arg4[%c0_16, %c0_17] : memref<1x128xf32, #tpu.memory_space<vmem>>, vector<1x128xf32>
    %cst_18 = arith.constant 9.99999974E-6 : f32
    %45 = vector.broadcast %cst_18 : f32 to vector<1x128xf32>
    %46 = arith.addf %41, %45 : vector<1x128xf32>
    %47 = math.rsqrt %46 : vector<1x128xf32>
    %48 = arith.mulf %44, %47 : vector<1x128xf32>
    %49 = vector.broadcast %48 : vector<1x128xf32> to vector<32x128xf32>
    %50 = arith.mulf %43, %49 : vector<32x128xf32>
    %c0_19 = arith.constant 0 : index
    %c0_20 = arith.constant 0 : index
    %51 = vector.load %arg5[%c0_19, %c0_20] : memref<1x128xf32, #tpu.memory_space<vmem>>, vector<1x128xf32>
    %52 = vector.broadcast %51 : vector<1x128xf32> to vector<32x128xf32>
    %53 = arith.addf %50, %52 : vector<32x128xf32>
    %cst_21 = arith.constant 0.000000e+00 : f32
    %54 = vector.broadcast %cst_21 : f32 to vector<32x128xf32>
    %55 = arith.maximumf %53, %54 : vector<32x128xf32>
    %cst_22 = arith.constant 0.000000e+00 : f32
    %56 = vector.broadcast %cst_22 : f32 to vector<1x128xf32>
    %57 = vector.extract_strided_slice %55 {offsets = [0, 0], sizes = [31, 128], strides = [1, 1]} : vector<32x128xf32> to vector<31x128xf32>
    %58 = tpu.concatenate %56, %57 in 0 : vector<1x128xf32>, vector<31x128xf32> -> vector<32x128xf32>
    %59 = vector.broadcast %0 : vector<32x1xf32> to vector<32x128xf32>
    %60 = arith.mulf %58, %59 : vector<32x128xf32>
    %61 = vector.extract_strided_slice %55 {offsets = [1, 0], sizes = [31, 128], strides = [1, 1]} : vector<32x128xf32> to vector<31x128xf32>
    %62 = tpu.concatenate %61, %56 in 0 : vector<31x128xf32>, vector<1x128xf32> -> vector<32x128xf32>
    %63 = vector.broadcast %1 : vector<32x1xf32> to vector<32x128xf32>
    %64 = arith.mulf %62, %63 : vector<32x128xf32>
    %65 = tpu.concatenate %60, %55, %64 in 1 : vector<32x128xf32>, vector<32x128xf32>, vector<32x128xf32> -> vector<32x384xf32>
    %c0_23 = arith.constant 0 : index
    %c0_24 = arith.constant 0 : index
    %66 = vector.load %arg6[%c0_23, %c0_24] : memref<384x128xf32, #tpu.memory_space<vmem>>, vector<384x128xf32>
    %cst_25 = arith.constant dense<0.000000e+00> : vector<32x128xf32>
    %67 = tpu.matmul %65, %66, %cst_25 {dimension_numbers = #tpu.dot_dimension_numbers<[1], [0], [0], [1], [0, 0, 1, 1], [], []>} : vector<32x384xf32>, vector<384x128xf32>, vector<32x128xf32> -> vector<32x128xf32>
    %cst_26 = arith.constant dense<0.000000e+00> : vector<128xf32>
    %68 = vector.multi_reduction <add>, %67, %cst_26 [0] : vector<32x128xf32> to vector<128xf32>
    %69 = vector.shape_cast %68 : vector<128xf32> to vector<1x128xf32>
    %c8_i32_27 = arith.constant 8 : i32
    %70 = tpu.dynamic_rotate %69 by %c8_i32_27 dim 1 : vector<1x128xf32>, i32 -> vector<1x128xf32>
    %71 = arith.addf %69, %70 : vector<1x128xf32>
    %c16_i32_28 = arith.constant 16 : i32
    %72 = tpu.dynamic_rotate %71 by %c16_i32_28 dim 1 : vector<1x128xf32>, i32 -> vector<1x128xf32>
    %73 = arith.addf %71, %72 : vector<1x128xf32>
    %c32_i32_29 = arith.constant 32 : i32
    %74 = tpu.dynamic_rotate %73 by %c32_i32_29 dim 1 : vector<1x128xf32>, i32 -> vector<1x128xf32>
    %75 = arith.addf %73, %74 : vector<1x128xf32>
    %c64_i32_30 = arith.constant 64 : i32
    %76 = tpu.dynamic_rotate %75 by %c64_i32_30 dim 1 : vector<1x128xf32>, i32 -> vector<1x128xf32>
    %77 = arith.addf %75, %76 : vector<1x128xf32>
    %78 = arith.mulf %67, %67 : vector<32x128xf32>
    %cst_31 = arith.constant dense<0.000000e+00> : vector<128xf32>
    %79 = vector.multi_reduction <add>, %78, %cst_31 [0] : vector<32x128xf32> to vector<128xf32>
    %80 = vector.shape_cast %79 : vector<128xf32> to vector<1x128xf32>
    %c8_i32_32 = arith.constant 8 : i32
    %81 = tpu.dynamic_rotate %80 by %c8_i32_32 dim 1 : vector<1x128xf32>, i32 -> vector<1x128xf32>
    %82 = arith.addf %80, %81 : vector<1x128xf32>
    %c16_i32_33 = arith.constant 16 : i32
    %83 = tpu.dynamic_rotate %82 by %c16_i32_33 dim 1 : vector<1x128xf32>, i32 -> vector<1x128xf32>
    %84 = arith.addf %82, %83 : vector<1x128xf32>
    %c32_i32_34 = arith.constant 32 : i32
    %85 = tpu.dynamic_rotate %84 by %c32_i32_34 dim 1 : vector<1x128xf32>, i32 -> vector<1x128xf32>
    %86 = arith.addf %84, %85 : vector<1x128xf32>
    %c64_i32_35 = arith.constant 64 : i32
    %87 = tpu.dynamic_rotate %86 by %c64_i32_35 dim 1 : vector<1x128xf32>, i32 -> vector<1x128xf32>
    %88 = arith.addf %86, %87 : vector<1x128xf32>
    %cst_36 = arith.constant 0.001953125 : f32
    %89 = vector.broadcast %cst_36 : f32 to vector<1x128xf32>
    %90 = arith.mulf %77, %89 : vector<1x128xf32>
    %cst_37 = arith.constant 0.001953125 : f32
    %91 = vector.broadcast %cst_37 : f32 to vector<1x128xf32>
    %92 = arith.mulf %88, %91 : vector<1x128xf32>
    %93 = arith.mulf %90, %90 : vector<1x128xf32>
    %94 = arith.subf %92, %93 : vector<1x128xf32>
    %95 = vector.broadcast %90 : vector<1x128xf32> to vector<32x128xf32>
    %96 = arith.subf %67, %95 : vector<32x128xf32>
    %c0_38 = arith.constant 0 : index
    %c0_39 = arith.constant 0 : index
    %97 = vector.load %arg7[%c0_38, %c0_39] : memref<1x128xf32, #tpu.memory_space<vmem>>, vector<1x128xf32>
    %cst_40 = arith.constant 9.99999974E-6 : f32
    %98 = vector.broadcast %cst_40 : f32 to vector<1x128xf32>
    %99 = arith.addf %94, %98 : vector<1x128xf32>
    %100 = math.rsqrt %99 : vector<1x128xf32>
    %101 = arith.mulf %97, %100 : vector<1x128xf32>
    %102 = vector.broadcast %101 : vector<1x128xf32> to vector<32x128xf32>
    %103 = arith.mulf %96, %102 : vector<32x128xf32>
    %c0_41 = arith.constant 0 : index
    %c0_42 = arith.constant 0 : index
    %104 = vector.load %arg8[%c0_41, %c0_42] : memref<1x128xf32, #tpu.memory_space<vmem>>, vector<1x128xf32>
    %105 = vector.broadcast %104 : vector<1x128xf32> to vector<32x128xf32>
    %106 = arith.addf %103, %105 : vector<32x128xf32>
    %c0_43 = arith.constant 0 : index
    %c0_44 = arith.constant 0 : index
    %107 = vector.load %arg9[%c0_43, %c0_44] : memref<64x128xf32, #tpu.memory_space<vmem>>, vector<64x128xf32>
    %cst_45 = arith.constant dense<0.000000e+00> : vector<32x128xf32>
    %108 = tpu.matmul %2, %107, %cst_45 {dimension_numbers = #tpu.dot_dimension_numbers<[1], [0], [0], [1], [0, 0, 1, 1], [], []>} : vector<32x64xf32>, vector<64x128xf32>, vector<32x128xf32> -> vector<32x128xf32>
    %cst_46 = arith.constant dense<0.000000e+00> : vector<128xf32>
    %109 = vector.multi_reduction <add>, %108, %cst_46 [0] : vector<32x128xf32> to vector<128xf32>
    %110 = vector.shape_cast %109 : vector<128xf32> to vector<1x128xf32>
    %c8_i32_47 = arith.constant 8 : i32
    %111 = tpu.dynamic_rotate %110 by %c8_i32_47 dim 1 : vector<1x128xf32>, i32 -> vector<1x128xf32>
    %112 = arith.addf %110, %111 : vector<1x128xf32>
    %c16_i32_48 = arith.constant 16 : i32
    %113 = tpu.dynamic_rotate %112 by %c16_i32_48 dim 1 : vector<1x128xf32>, i32 -> vector<1x128xf32>
    %114 = arith.addf %112, %113 : vector<1x128xf32>
    %c32_i32_49 = arith.constant 32 : i32
    %115 = tpu.dynamic_rotate %114 by %c32_i32_49 dim 1 : vector<1x128xf32>, i32 -> vector<1x128xf32>
    %116 = arith.addf %114, %115 : vector<1x128xf32>
    %c64_i32_50 = arith.constant 64 : i32
    %117 = tpu.dynamic_rotate %116 by %c64_i32_50 dim 1 : vector<1x128xf32>, i32 -> vector<1x128xf32>
    %118 = arith.addf %116, %117 : vector<1x128xf32>
    %119 = arith.mulf %108, %108 : vector<32x128xf32>
    %cst_51 = arith.constant dense<0.000000e+00> : vector<128xf32>
    %120 = vector.multi_reduction <add>, %119, %cst_51 [0] : vector<32x128xf32> to vector<128xf32>
    %121 = vector.shape_cast %120 : vector<128xf32> to vector<1x128xf32>
    %c8_i32_52 = arith.constant 8 : i32
    %122 = tpu.dynamic_rotate %121 by %c8_i32_52 dim 1 : vector<1x128xf32>, i32 -> vector<1x128xf32>
    %123 = arith.addf %121, %122 : vector<1x128xf32>
    %c16_i32_53 = arith.constant 16 : i32
    %124 = tpu.dynamic_rotate %123 by %c16_i32_53 dim 1 : vector<1x128xf32>, i32 -> vector<1x128xf32>
    %125 = arith.addf %123, %124 : vector<1x128xf32>
    %c32_i32_54 = arith.constant 32 : i32
    %126 = tpu.dynamic_rotate %125 by %c32_i32_54 dim 1 : vector<1x128xf32>, i32 -> vector<1x128xf32>
    %127 = arith.addf %125, %126 : vector<1x128xf32>
    %c64_i32_55 = arith.constant 64 : i32
    %128 = tpu.dynamic_rotate %127 by %c64_i32_55 dim 1 : vector<1x128xf32>, i32 -> vector<1x128xf32>
    %129 = arith.addf %127, %128 : vector<1x128xf32>
    %cst_56 = arith.constant 0.001953125 : f32
    %130 = vector.broadcast %cst_56 : f32 to vector<1x128xf32>
    %131 = arith.mulf %118, %130 : vector<1x128xf32>
    %cst_57 = arith.constant 0.001953125 : f32
    %132 = vector.broadcast %cst_57 : f32 to vector<1x128xf32>
    %133 = arith.mulf %129, %132 : vector<1x128xf32>
    %134 = arith.mulf %131, %131 : vector<1x128xf32>
    %135 = arith.subf %133, %134 : vector<1x128xf32>
    %136 = vector.broadcast %131 : vector<1x128xf32> to vector<32x128xf32>
    %137 = arith.subf %108, %136 : vector<32x128xf32>
    %c0_58 = arith.constant 0 : index
    %c0_59 = arith.constant 0 : index
    %138 = vector.load %arg10[%c0_58, %c0_59] : memref<1x128xf32, #tpu.memory_space<vmem>>, vector<1x128xf32>
    %cst_60 = arith.constant 9.99999974E-6 : f32
    %139 = vector.broadcast %cst_60 : f32 to vector<1x128xf32>
    %140 = arith.addf %135, %139 : vector<1x128xf32>
    %141 = math.rsqrt %140 : vector<1x128xf32>
    %142 = arith.mulf %138, %141 : vector<1x128xf32>
    %143 = vector.broadcast %142 : vector<1x128xf32> to vector<32x128xf32>
    %144 = arith.mulf %137, %143 : vector<32x128xf32>
    %c0_61 = arith.constant 0 : index
    %c0_62 = arith.constant 0 : index
    %145 = vector.load %arg11[%c0_61, %c0_62] : memref<1x128xf32, #tpu.memory_space<vmem>>, vector<1x128xf32>
    %146 = vector.broadcast %145 : vector<1x128xf32> to vector<32x128xf32>
    %147 = arith.addf %144, %146 : vector<32x128xf32>
    %148 = arith.addf %106, %147 : vector<32x128xf32>
    %cst_63 = arith.constant 0.000000e+00 : f32
    %149 = vector.broadcast %cst_63 : f32 to vector<32x128xf32>
    %150 = arith.maximumf %148, %149 : vector<32x128xf32>
    %c0_64 = arith.constant 0 : index
    %c0_65 = arith.constant 0 : index
    %151 = vector.load %arg12[%c0_64, %c0_65] : memref<32x128xf32, #tpu.memory_space<vmem>>, vector<32x128xf32>
    tpu.vector_store %arg12[%c0_64, %c0_65], %150 {strides = array<i32>} : memref<32x128xf32, #tpu.memory_space<vmem>>, vector<32x128xf32>,
    return
  }
}

</mosaic_0001>

<bundles_post_ra>
// kernel: residual_block_pallas.1
= control target key start
LH: loop header
LB: loop body
LE: loop exit
PB: predicated region body
PF: predicated region fallthrough
CT: control target
= control target key end

     0   :  { %v768_v0 = vmov 0   ;;  %s769_s25 = smov 64   ;;  %vm57_vm0 = vcmask 1040384   ;;  %vm143_vm1 = vcmask 523264   ;;  %vm94_vm2 = vcmask 1046528   ;;  %s771_s22 = smov 16   ;;  %s1336_s1 = inlined_call_operand.vmem [shape: f32[32,1], index: 1, kind: input, shape index: {}]   ;;  %s1337_s0 = inlined_call_operand.vmem [shape: f32[32,64], index: 0, kind: input, shape index: {}]   ;;  %s1338_s2 = inlined_call_operand.vmem [shape: f32[32,1], index: 2, kind: input, shape index: {}]   ;;  %s1339_s3 = inlined_call_operand.vmem [shape: f32[192,128], index: 3, kind: input, shape index: {}]   ;;  %s1340_s5 = inlined_call_operand.vmem [shape: f32[1,128], index: 5, kind: input, shape index: {}]   ;;  %s1341_s6 = inlined_call_operand.vmem [shape: f32[384,128], index: 6, kind: input, shape index: {}]   ;;  %s1342_s9 = inlined_call_operand.vmem [shape: f32[64,128], index: 9, kind: input, shape index: {}]   ;;  %s1343_s4 = inlined_call_operand.vmem [shape: f32[1,128], index: 4, kind: input, shape index: {}]   ;;  %s1344_s8 = inlined_call_operand.vmem [shape: f32[1,128], index: 8, kind: input, shape index: {}]   ;;  %s1345_s11 = inlined_call_operand.vmem [shape: f32[1,128], index: 11, kind: input, shape index: {}]   ;;  %s1346_s7 = inlined_call_operand.vmem [shape: f32[1,128], index: 7, kind: input, shape index: {}]   ;;  %s1347_s10 = inlined_call_operand.vmem [shape: f32[1,128], index: 10, kind: input, shape index: {}]   ;;  %s1348_s12 = inlined_call_operand.vmem [shape: f32[32,128], index: 12, kind: output, shape index: {}]  }
   0x1   :  { %756 = vset.pattern.permute.xlu0 %v768_v0  ;;  %v41_v1 = vld [vmem:[%s1336_s1] sm:$0xff]  ;;  %757 = vset.pattern.permute.xlu1 %v768_v0  ;;  %v46_v3 = vld [vmem:[%s1338_s2 + $0x8] sm:$0xff]  ;;  %v163_v4 = vld [vmem:[%s1339_s3 + $0x78] sm:$0xff]  ;;  %s772_s23 = smov 32  }
   0x2   :  { %v844_v2 = vld [vmem:[%s1337_s0] sm:$0xff]  ;;  %72 = vperm.xlu0 %756, %v41_v1   ;;  %758 = vset.pattern.permute.xlu2 %v768_v0  ;;  %v162_v5 = vld [vmem:[%s1339_s3 + $0x70] sm:$0xff]  ;;  %v42_v7 = vld [vmem:[%s1336_s1 + $0x8] sm:$0xff] }
   0x3   :  { %131 = vrot.lane.b32.xlu1 %v844_v2, %s769_s25  ;;  %114 = vperm.xlu2 %758, %v46_v3   ;;  %v45_v6 = vld [vmem:[%s1338_s2] sm:$0xff]  ;;  %v161_v8 = vld [vmem:[%s1339_s3 + $0x68] sm:$0xff]  ;;  %v171_v10 = vld [vmem:[%s1339_s3 + $0xb8] sm:$0xff]  ;;  %v58_v37 = vrot.slane %v844_v2, 7  ;;  %v95_v44 = vrot.slane %v844_v2, 1 }
   0x4   :  { %184 = vmatpush.msra.mxu0 %v163_v4  ;;  %v869_v9 = vld [vmem:[%s1337_s0 + $0x8] sm:$0xff]  ;;  %v160_v11 = vld [vmem:[%s1339_s3 + $0x60] sm:$0xff]  ;;  %v170_v12 = vld [vmem:[%s1339_s3 + $0xb0] sm:$0xff]  ;;  %221 = vmatpush.msra.mxu1 %v171_v10 }
   0x5   :  { %v159_v13 = vld [vmem:[%s1339_s3 + $0x58] sm:$0xff]  ;;  %v169_v14 = vld [vmem:[%s1339_s3 + $0xa8] sm:$0xff]  ;;  %v158_v15 = vld [vmem:[%s1339_s3 + $0x50] sm:$0xff]  ;;  %v69_v39 = vsel %vm57_vm0, 0.0, %v58_v37  ;;  %v96_v43 = vrot.slane %v869_v9, 1  ;;  %v59_v45 = vrot.slane %v869_v9, 7 }
   0x6   :  { %185 = vmatpush.msra.mxu0 %v162_v5  ;;  %222 = vmatpush.msra.mxu1 %v170_v12  ;;  %v43_v16 = vld [vmem:[%s1336_s1 + $0x10] sm:$0xff]  ;;  %v157_v18 = vld [vmem:[%s1339_s3 + $0x48] sm:$0xff]  ;;  %v156_v20 = vld [vmem:[%s1339_s3 + $0x40] sm:$0xff] }
   0x7   :  { %v47_v17 = vld [vmem:[%s1338_s2 + $0x10] sm:$0xff]  ;;  %v155_v21 = vld [vmem:[%s1339_s3 + $0x38] sm:$0xff]  ;;  %v153_v25 = vld [vmem:[%s1339_s3 + $0x28] sm:$0xff]  ;;  %v97_v48 = vsel %vm94_vm2, %v95_v44, %v96_v43  ;;  %v60_v49 = vsel %vm57_vm0, %v58_v37, %v59_v45 }
   0x8   :  { %186 = vmatpush.msra.mxu0 %v161_v8  ;;  %223 = vmatpush.msra.mxu1 %v169_v14  ;;  %v903_v19 = vld [vmem:[%s1337_s0 + $0x10] sm:$0xff]  ;;  %v44_v23 = vld [vmem:[%s1336_s1 + $0x18] sm:$0xff]  ;;  %v152_v27 = vld [vmem:[%s1339_s3 + $0x20] sm:$0xff] }
   0x9   :  { %v154_v22 = vld [vmem:[%s1339_s3 + $0x30] sm:$0xff]  ;;  %v48_v24 = vld [vmem:[%s1338_s2 + $0x18] sm:$0xff]  ;;  %v149_v30 = vld [vmem:[%s1339_s3 + $0x8] sm:$0xff]  ;;  %v98_v54 = vrot.slane %v903_v19, 1  ;;  %v61_v55 = vrot.slane %v903_v19, 7 }
   0xa   :  { %109 = vperm.xlu0 %756, %v45_v6   ;;  %187 = vmatpush.msra.mxu0 %v160_v11  ;;  %v928_v26 = vld [vmem:[%s1337_s0 + $0x18] sm:$0xff]  ;;  %v150_v29 = vld [vmem:[%s1339_s3 + $0x10] sm:$0xff]  ;;  %v168_v31 = vld [vmem:[%s1339_s3 + $0xa0] sm:$0xff] }
   0xb   :  { %77 = vperm.xlu1 %757, %v42_v7   ;;  %133 = vrot.lane.b32.xlu2 %v869_v9, %s769_s25  ;;  %v151_v28 = vld [vmem:[%s1339_s3 + $0x18] sm:$0xff]  ;;  %v148_v32 = vld [vmem:[%s1339_s3] sm:$0xff]  ;;  %v166_v34 = vld [vmem:[%s1339_s3 + $0x90] sm:$0xff]  ;;  %v99_v57 = vsel %vm94_vm2, %v96_v43, %v98_v54  ;;  %v62_v58 = vsel %vm57_vm0, %v59_v45, %v61_v55  ;;  %v100_v63 = vrot.slane %v928_v26, 1  ;;  %v63_v0 = vrot.slane %v928_v26, 7 }
   0xc   :  { %188 = vmatpush.msra.mxu0 %v159_v13  ;;  %224 = vmatpush.msra.mxu1 %v168_v31  ;;  %v167_v33 = vld [vmem:[%s1339_s3 + $0x98] sm:$0xff]  ;;  %v165_v35 = vld [vmem:[%s1339_s3 + $0x88] sm:$0xff]  ;;  %v164_v36 = vld [vmem:[%s1339_s3 + $0x80] sm:$0xff]  ;;  %s770_s3 = smov 8  }
   0xd   :  { %v101_v4 = vsel %vm94_vm2, %v98_v54, %v100_v63  ;;  %v64_v5 = vsel %vm57_vm0, %v61_v55, %v63_v0  ;;  %v106_v12 = vsel %vm94_vm2, %v100_v63, 0.0 }
   0xe   :  { %189 = vmatpush.msra.mxu0 %v158_v15  ;;  %225 = vmatpush.msra.mxu1 %v167_v33 }
  0x10   :  { %190 = vmatpush.msra.mxu0 %v157_v18  ;;  %226 = vmatpush.msra.mxu1 %v166_v34 }
  0x12   :  { %82 = vperm.xlu0 %756, %v43_v16   ;;  %191 = vmatpush.msra.mxu0 %v156_v20 }
  0x13   :  { %119 = vperm.xlu1 %757, %v47_v17   ;;  %135 = vrot.lane.b32.xlu2 %v903_v19, %s769_s25 }
  0x14   :  { %192 = vmatpush.msra.mxu0 %v155_v21  ;;  %227 = vmatpush.msra.mxu1 %v165_v35 }
  0x16   :  { %193 = vmatpush.msra.mxu0 %v154_v22  ;;  %228 = vmatpush.msra.mxu1 %v164_v36 }
  0x18   :  { %194 = vmatpush.msra.mxu0 %v153_v25 }
  0x1a   :  { %87 = vperm.xlu0 %756, %v44_v23   ;;  %195 = vmatpush.msra.mxu0 %v152_v27 }
  0x1b   :  { %124 = vperm.xlu1 %757, %v48_v24   ;;  %137 = vrot.lane.b32.xlu2 %v928_v26, %s769_s25 }
  0x1c   :  { %196 = vmatpush.msra.mxu0 %v151_v28 }
  0x1e   :  { %197 = vmatpush.msra.mxu0 %v150_v29 }
  0x20   :  { %198 = vmatpush.msra.mxu0 %v149_v30 }
  0x22   :  { %199 = vmatpush.msra.mxu0 %v148_v32 }
  0x5d   :  { %v963_v38 = vpop.permute.xlu2 %114 }
  0x5e   :  { %v128_v61 = vmul.f32 %v963_v38, %v99_v57 }
  0x65   :  { %v134_v47 = vpop.permute.xlu2 %133 }
  0x6d   :  { %v136_v59 = vpop.permute.xlu2 %135 }
  0x74   :  { %v966_v40 = vpop.permute.xlu0 %72 }
  0x75   :  { %v132_v41 = vpop.permute.xlu1 %131  ;;  %v90_v42 = vmul.f32 %v966_v40, %v69_v39  ;;  %v138_v7 = vpop.permute.xlu2 %137 }
  0x77   :  { %v144_v46 = vsel %vm143_vm1, %v90_v42, %v132_v41 }
  0x78   :  { %200 = vmatmul.f32.vlgmr.msra.gmra.mxu0 %v144_v46 }
  0x7c   :  { %v975_v50 = vpop.permute.xlu0 %109 }
  0x7d   :  { %v977_v51 = vpop.permute.xlu1 %77  ;;  %v127_v52 = vmul.f32 %v975_v50, %v97_v48 }
  0x7e   :  { %v91_v53 = vmul.f32 %v977_v51, %v60_v49 }
  0x7f   :  { %727 = vmatmul.msk.f32.vlgmr.msra.gmra.mxu1 %vm143_vm1, %v127_v52 }
  0x80   :  { %v145_v56 = vsel %vm143_vm1, %v91_v53, %v134_v47 }
  0x81   :  { %203 = vmatmul.f32.gmra.mxu0 %v145_v56 }
  0x84   :  { %v987_v60 = vpop.permute.xlu0 %82 }
  0x85   :  { %v92_v62 = vmul.f32 %v987_v60, %v62_v58  ;;  %v995_v3 = vpop.permute.xlu1 %119 }
  0x86   :  { %v129_v8 = vmul.f32 %v995_v3, %v101_v4 }
  0x87   :  { %728 = vmatmul.msk.f32.gmra.mxu1 %vm143_vm1, %v128_v61  ;;  %v146_v1 = vsel %vm143_vm1, %v92_v62, %v136_v59 }
  0x89   :  { %206 = vmatmul.f32.gmra.mxu0 %v146_v1 }
  0x8c   :  { %v999_v6 = vpop.permute.xlu0 %87 }
  0x8d   :  { %v93_v10 = vmul.f32 %v999_v6, %v64_v5  ;;  %v1006_v13 = vpop.permute.xlu1 %124 }
  0x8e   :  { %v130_v14 = vmul.f32 %v1006_v13, %v106_v12  ;;  %v412_v12 = vld [vmem:[%s1341_s6 + $0x178] sm:$0xff] }
  0x8f   :  { %729 = vmatmul.msk.f32.gmra.mxu1 %vm143_vm1, %v129_v8  ;;  %v147_v11 = vsel %vm143_vm1, %v93_v10, %v138_v7  ;;  %v396_v7 = vld [vmem:[%s1341_s6 + $0xf8] sm:$0xff]  ;;  %v395_v8 = vld [vmem:[%s1341_s6 + $0xf0] sm:$0xff]  ;;  %v394_v10 = vld [vmem:[%s1341_s6 + $0xe8] sm:$0xff] }
  0x90   :  { %442 = vmatpush.msra.mxu3 %v396_v7  ;;  %471 = vmatpush.msrb.mxu1 %v412_v12  ;;  %v367_v7 = vld [vmem:[%s1341_s6 + $0x10] sm:$0xff]  ;;  %v366_v12 = vld [vmem:[%s1341_s6 + $0x8] sm:$0xff] }
  0x91   :  { %209 = vmatmul.f32.gmra.mxu0 %v147_v11  ;;  %v380_v11 = vld [vmem:[%s1341_s6 + $0x78] sm:$0xff] }
  0x92   :  { %443 = vmatpush.msra.mxu3 %v395_v8  ;;  %413 = vmatpush.msra.mxu2 %v380_v11 }
  0x94   :  { %444 = vmatpush.msra.mxu3 %v394_v10 }
  0x97   :  { %730 = vmatmul.msk.f32.gmra.mxu1 %vm143_vm1, %v130_v14  ;;  %v393_v14 = vld [vmem:[%s1341_s6 + $0xe0] sm:$0xff] }
  0x98   :  { %445 = vmatpush.msra.mxu3 %v393_v14  ;;  %v398_v14 = vld [vmem:[%s1341_s6 + $0x108] sm:$0xff] }
  0xf5   :  { %v201_v15 = vpop.f32.mrf.mxu0 }
  0xfc   :  { %v230_v16 = vpop.f32.mrf.mxu1 }
  0xfd   :  { %v1012_v23 = vadd.f32 %v230_v16, %v201_v15  ;;  %v379_v15 = vld [vmem:[%s1341_s6 + $0x70] sm:$0xff] }
  0xfe   :  { %v204_v17 = vpop.f32.mrf.mxu0  ;;  %v411_v16 = vld [vmem:[%s1341_s6 + $0x170] sm:$0xff]  ;;  %414 = vmatpush.msra.mxu2 %v379_v15  ;;  %v365_v15 = vld [vmem:[%s1341_s6] sm:$0xff] }
  0xff   :  { %v263_v27 = vmul.f32 %v1012_v23, %v1012_v23  ;;  %472 = vmatpush.msrb.mxu1 %v411_v16 }
 0x104   :  { %v233_v18 = vpop.f32.mrf.mxu1 }
 0x105   :  { %v1010_v22 = vadd.f32 %v233_v18, %v204_v17  ;;  %v392_v17 = vld [vmem:[%s1341_s6 + $0xd8] sm:$0xff]  ;;  %v378_v18 = vld [vmem:[%s1341_s6 + $0x68] sm:$0xff] }
 0x106   :  { %v207_v20 = vpop.f32.mrf.mxu0  ;;  %446 = vmatpush.msra.mxu3 %v392_v17  ;;  %415 = vmatpush.msra.mxu2 %v378_v18  ;;  %v397_v17 = vld [vmem:[%s1341_s6 + $0x100] sm:$0xff]  ;;  %v590_v18 = vld [vmem:[%s1342_s9 + $0x38] sm:$0xff] }
 0x107   :  { %v264_v25 = vmul.f32 %v1010_v22, %v1010_v22  ;;  %v242_v28 = vadd.f32 %v1010_v22, %v1012_v23  ;;  %607 = vmatpush.msrb.mxu0 %v590_v18 }
 0x109   :  { %v267_v32 = vadd.f32 %v264_v25, %v263_v27  ;;  %v377_v25 = vld [vmem:[%s1341_s6 + $0x60] sm:$0xff] }
 0x10a   :  { %v409_v27 = vld [vmem:[%s1341_s6 + $0x160] sm:$0xff]  ;;  %416 = vmatpush.msra.mxu2 %v377_v25 }
 0x10c   :  { %v236_v21 = vpop.f32.mrf.mxu1 }
 0x10d   :  { %v1014_v24 = vadd.f32 %v236_v21, %v207_v20  ;;  %v410_v20 = vld [vmem:[%s1341_s6 + $0x168] sm:$0xff]  ;;  %v391_v21 = vld [vmem:[%s1341_s6 + $0xd0] sm:$0xff] }
 0x10e   :  { %v210_v30 = vpop.f32.mrf.mxu0  ;;  %473 = vmatpush.msrb.mxu1 %v410_v20  ;;  %447 = vmatpush.msra.mxu3 %v391_v21  ;;  %v589_v20 = vld [vmem:[%s1342_s9 + $0x30] sm:$0xff] }
 0x10f   :  { %v265_v29 = vmul.f32 %v1014_v24, %v1014_v24  ;;  %v243_v33 = vadd.f32 %v242_v28, %v1014_v24  ;;  %v390_v28 = vld [vmem:[%s1341_s6 + $0xc8] sm:$0xff]  ;;  %608 = vmatpush.msrb.mxu0 %v589_v20 }
 0x110   :  { %474 = vmatpush.msrb.mxu1 %v409_v27  ;;  %448 = vmatpush.msra.mxu3 %v390_v28  ;;  %v588_v28 = vld [vmem:[%s1342_s9 + $0x28] sm:$0xff] }
 0x111   :  { %v268_v35 = vadd.f32 %v267_v32, %v265_v29  ;;  %v376_v29 = vld [vmem:[%s1341_s6 + $0x58] sm:$0xff]  ;;  %v375_v32 = vld [vmem:[%s1341_s6 + $0x50] sm:$0xff]  ;;  %609 = vmatpush.msrb.mxu0 %v588_v28 }
 0x112   :  { %417 = vmatpush.msra.mxu2 %v376_v29 }
 0x114   :  { %v239_v31 = vpop.f32.mrf.mxu1  ;;  %418 = vmatpush.msra.mxu2 %v375_v32  ;;  %v297_v32 = vld [vmem:[%s1343_s4] sm:$0x1] }
 0x115   :  { %v1025_v34 = vadd.f32 %v239_v31, %v210_v30  ;;  %v408_v30 = vld [vmem:[%s1341_s6 + $0x158] sm:$0xff]  ;;  %v389_v31 = vld [vmem:[%s1341_s6 + $0xc0] sm:$0xff] }
 0x116   :  { %475 = vmatpush.msrb.mxu1 %v408_v30  ;;  %449 = vmatpush.msra.mxu3 %v389_v31  ;;  %v587_v30 = vld [vmem:[%s1342_s9 + $0x20] sm:$0xff] }
 0x117   :  { %v244_v36 = vadd.f32 %v243_v33, %v1025_v34  ;;  %v266_v37 = vmul.f32 %v1025_v34, %v1025_v34  ;;  %v407_v33 = vld [vmem:[%s1341_s6 + $0x150] sm:$0xff]  ;;  %610 = vmatpush.msrb.mxu0 %v587_v30 }
 0x118   :  { %476 = vmatpush.msrb.mxu1 %v407_v33 }
 0x119   :  { %v245_v39 = vrot.slane %v244_v36, 4  ;;  %v269_v41 = vadd.f32 %v268_v35, %v266_v37  ;;  %v388_v35 = vld [vmem:[%s1341_s6 + $0xb8] sm:$0xff]  ;;  %v406_v37 = vld [vmem:[%s1341_s6 + $0x148] sm:$0xff] }
 0x11a   :  { %450 = vmatpush.msra.mxu3 %v388_v35  ;;  %477 = vmatpush.msrb.mxu1 %v406_v37  ;;  %v586_v37 = vld [vmem:[%s1342_s9 + $0x18] sm:$0xff] }
 0x11b   :  { %v246_v42 = vadd.f32 %v245_v39, %v244_v36  ;;  %v270_v43 = vrot.slane %v269_v41, 4  ;;  %v374_v36 = vld [vmem:[%s1341_s6 + $0x48] sm:$0xff]  ;;  %v387_v39 = vld [vmem:[%s1341_s6 + $0xb0] sm:$0xff]  ;;  %611 = vmatpush.msrb.mxu0 %v586_v37 }
 0x11c   :  { %419 = vmatpush.msra.mxu2 %v374_v36  ;;  %451 = vmatpush.msra.mxu3 %v387_v39 }
 0x11d   :  { %v247_v44 = vrot.slane %v246_v42, 2  ;;  %v271_v45 = vadd.f32 %v270_v43, %v269_v41  ;;  %v373_v41 = vld [vmem:[%s1341_s6 + $0x40] sm:$0xff]  ;;  %v386_v43 = vld [vmem:[%s1341_s6 + $0xa8] sm:$0xff] }
 0x11e   :  { %420 = vmatpush.msra.mxu2 %v373_v41  ;;  %452 = vmatpush.msra.mxu3 %v386_v43 }
 0x11f   :  { %v248_v46 = vadd.f32 %v247_v44, %v246_v42  ;;  %v272_v47 = vrot.slane %v271_v45, 2  ;;  %v405_v42 = vld [vmem:[%s1341_s6 + $0x140] sm:$0xff]  ;;  %v372_v44 = vld [vmem:[%s1341_s6 + $0x38] sm:$0xff] }
 0x120   :  { %478 = vmatpush.msrb.mxu1 %v405_v42  ;;  %421 = vmatpush.msra.mxu2 %v372_v44 }
 0x121   :  { %v249_v48 = vrot.slane %v248_v46, 1  ;;  %v273_v49 = vadd.f32 %v272_v47, %v271_v45  ;;  %v404_v45 = vld [vmem:[%s1341_s6 + $0x138] sm:$0xff]  ;;  %v371_v47 = vld [vmem:[%s1341_s6 + $0x30] sm:$0xff] }
 0x122   :  { %479 = vmatpush.msrb.mxu1 %v404_v45  ;;  %422 = vmatpush.msra.mxu2 %v371_v47  ;;  %v759_v45 = vld [vmem:[%s1340_s5] ss:$0 sm:$0xff] }
 0x123   :  { %v250_v52 = vadd.f32 %v249_v48, %v248_v46  ;;  %v274_v53 = vrot.slane %v273_v49, 1  ;;  %v385_v46 = vld [vmem:[%s1341_s6 + $0xa0] sm:$0xff]  ;;  %v403_v48 = vld [vmem:[%s1341_s6 + $0x130] sm:$0xff] }
 0x124   :  { %453 = vmatpush.msra.mxu3 %v385_v46  ;;  %480 = vmatpush.msrb.mxu1 %v403_v48  ;;  %v585_v46 = vld [vmem:[%s1342_s9 + $0x10] sm:$0xff] }
 0x125   :  { %251 = vrot.lane.b32.xlu0 %v250_v52, %s770_s3  ;;  %v275_v54 = vadd.f32 %v274_v53, %v273_v49  ;;  %v384_v49 = vld [vmem:[%s1341_s6 + $0x98] sm:$0xff]  ;;  %v402_v53 = vld [vmem:[%s1341_s6 + $0x128] sm:$0xff]  ;;  %612 = vmatpush.msrb.mxu0 %v585_v46 }
 0x126   :  { %454 = vmatpush.msra.mxu3 %v384_v49  ;;  %481 = vmatpush.msrb.mxu1 %v402_v53 }
 0x127   :  { %276 = vrot.lane.b32.xlu1 %v275_v54, %s770_s3 }
 0x197   :  { %v252_v55 = vpop.permute.xlu0 %251 }
 0x198   :  { %v253_v56 = vadd.f32 %v252_v55, %v250_v52  ;;  %v370_v52 = vld [vmem:[%s1341_s6 + $0x28] sm:$0xff]  ;;  %v383_v55 = vld [vmem:[%s1341_s6 + $0x90] sm:$0xff] }
 0x199   :  { %v277_v57 = vpop.permute.xlu1 %276  ;;  %423 = vmatpush.msra.mxu2 %v370_v52  ;;  %455 = vmatpush.msra.mxu3 %v383_v55 }
 0x19a   :  { %v278_v58 = vadd.f32 %v277_v57, %v275_v54  ;;  %254 = vrot.lane.b32.xlu2 %v253_v56, %s771_s22  ;;  %v401_v57 = vld [vmem:[%s1341_s6 + $0x120] sm:$0xff] }
 0x19b   :  { %482 = vmatpush.msrb.mxu1 %v401_v57 }
 0x19c   :  { %279 = vrot.lane.b32.xlu0 %v278_v58, %s771_s22 }
 0x1f4   :  { %v255_v59 = vpop.permute.xlu2 %254 }
 0x1f5   :  { %v256_v61 = vadd.f32 %v255_v59, %v253_v56  ;;  %v369_v56 = vld [vmem:[%s1341_s6 + $0x20] sm:$0xff]  ;;  %v382_v59 = vld [vmem:[%s1341_s6 + $0x88] sm:$0xff] }
 0x1f6   :  { %424 = vmatpush.msra.mxu2 %v369_v56  ;;  %456 = vmatpush.msra.mxu3 %v382_v59 }
 0x1f7   :  { %257 = vrot.lane.b32.xlu1 %v256_v61, %s772_s23 }
 0x20e   :  { %v280_v62 = vpop.permute.xlu0 %279 }
 0x20f   :  { %v281_v63 = vadd.f32 %v280_v62, %v278_v58  ;;  %v368_v62 = vld [vmem:[%s1341_s6 + $0x18] sm:$0xff] }
 0x210   :  { %425 = vmatpush.msra.mxu2 %v368_v62 }
 0x211   :  { %282 = vrot.lane.b32.xlu2 %v281_v63, %s772_s23 }
 0x212   :  { %426 = vmatpush.msra.mxu2 %v367_v7 }
 0x214   :  { %427 = vmatpush.msra.mxu2 %v366_v12 }
 0x216   :  { %428 = vmatpush.msra.mxu2 %v365_v15 }
 0x218   :  { %735 = vmatpush.msrb.mxu2 %v590_v18 }
 0x21a   :  { %737 = vmatpush.msrb.mxu2 %v589_v20 }
 0x21c   :  { %739 = vmatpush.msrb.mxu2 %v588_v28 }
 0x21e   :  { %741 = vmatpush.msrb.mxu2 %v587_v30 }
 0x220   :  { %743 = vmatpush.msrb.mxu2 %v586_v37 }
 0x222   :  { %745 = vmatpush.msrb.mxu2 %v585_v46 }
 0x269   :  { %v258_v0 = vpop.permute.xlu1 %257 }
 0x26a   :  { %v1036_v1 = vadd.f32 %v258_v0, %v256_v61 }
 0x26b   :  { %v283_v4 = vpop.permute.xlu2 %282 }
 0x26c   :  { %v1038_v5 = vadd.f32 %v283_v4, %v281_v63  ;;  %260 = vrot.lane.b32.xlu0 %v1036_v1, %s769_s25  ;;  %v400_v63 = vld [vmem:[%s1341_s6 + $0x118] sm:$0xff] }
 0x26d   :  { %483 = vmatpush.msrb.mxu1 %v400_v63 }
 0x26e   :  { %285 = vrot.lane.b32.xlu1 %v1038_v5, %s769_s25 }
 0x2de   :  { %v261_v54 = vpop.permute.xlu0 %260 }
 0x2df   :  { %v262_v58 = vadd.f32 %v261_v54, %v1036_v1  ;;  %v381_v1 = vld [vmem:[%s1341_s6 + $0x80] sm:$0xff] }
 0x2e0   :  { %v286_v61 = vpop.permute.xlu1 %285  ;;  %457 = vmatpush.msra.mxu3 %v381_v1  ;;  %v583_v54 = vld [vmem:[%s1342_s9] sm:$0xff] }
 0x2e1   :  { %v288_v0 = vmul.f32 0.001953125, %v262_v58  ;;  %v287_v4 = vadd.f32 %v286_v61, %v1038_v5  ;;  %v399_v5 = vld [vmem:[%s1341_s6 + $0x110] sm:$0xff] }
 0x2e2   :  { %484 = vmatpush.msrb.mxu1 %v399_v5  ;;  %736 = vmatpush.msrb.mxu3 %v590_v18 }
 0x2e3   :  { %v290_v8 = vmul.f32 %v288_v0, %v288_v0  ;;  %v289_v10 = vmul.f32 0.001953125, %v287_v4  ;;  %v292_v35 = vperm.slane %v288_v0, 0 }
 0x2e4   :  { %485 = vmatpush.msrb.mxu1 %v398_v14  ;;  %738 = vmatpush.msrb.mxu3 %v589_v20 }
 0x2e5   :  { %v291_v11 = vsub.f32 %v289_v10, %v290_v8  ;;  %v294_v41 = vsub.f32 %v1010_v22, %v292_v35  ;;  %v295_v42 = vsub.f32 %v1014_v24, %v292_v35  ;;  %v293_v44 = vsub.f32 %v1012_v23, %v292_v35  ;;  %v584_v23 = vld [vmem:[%s1342_s9 + $0x8] sm:$0xff] }
 0x2e6   :  { %486 = vmatpush.msrb.mxu1 %v397_v17  ;;  %740 = vmatpush.msrb.mxu3 %v588_v28  ;;  %v296_v53 = vsub.f32 %v1025_v34, %v292_v35 }
 0x2e7   :  { %v298_v16 = vadd.f32 1e-05, %v291_v11  ;;  %747 = vmatpush.msrb.mxu2 %v584_v23  ;;  %613 = vmatpush.msrb.mxu0 %v584_v23 }
 0x2e8   :  { %742 = vmatpush.msrb.mxu3 %v587_v30 }
 0x2e9   :  { %762 = vrsqrt.f32 %v298_v16  ;;  %vm305_vm4 = vweird.f32 %v298_v16  ;;  %749 = vmatpush.msrb.mxu2 %v583_v54  ;;  %614 = vmatpush.msrb.mxu0 %v583_v54 }
 0x2ea   :  { %744 = vmatpush.msrb.mxu3 %v586_v37  ;;  %731 = vmatmul.msk.f32.vlgmr.msrb.gmra.mxu0 %vm143_vm1, %v844_v2 }
 0x2ec   :  { %746 = vmatpush.msrb.mxu3 %v585_v46 }
 0x2ee   :  { %748 = vmatpush.msrb.mxu3 %v584_v23 }
 0x2ef   :  { %v763_v21 = vpop.eup %762 }
 0x2f0   :  { %v300_v25 = vmul.f32 %v763_v21, %v298_v16  ;;  %vm306_vm3 = vweird.f32 %v763_v21  ;;  %750 = vmatpush.msrb.mxu3 %v583_v54 }
 0x2f1   :  { %vm307_vm5 = vmor %vm305_vm4, %vm306_vm3 }
 0x2f2   :  { %v301_v27 = vmul.f32 %v763_v21, %v300_v25 }
 0x2f4   :  { %v302_v29 = vmul.f32 0.5, %v301_v27 }
 0x2f6   :  { %v303_v31 = vsub.f32 1.5, %v302_v29 }
 0x2f8   :  { %v304_v33 = vmul.f32 %v763_v21, %v303_v31 }
 0x2fa   :  { %v308_v36 = vsel %vm307_vm5, %v763_v21, %v304_v33 }
 0x2fb   :  { %v309_v39 = vmul.f32 %v308_v36, %v297_v32 }
 0x2fd   :  { %v311_v43 = vperm.slane %v309_v39, 0 }
 0x2ff   :  { %v313_v47 = vmul.f32 %v311_v43, %v293_v44  ;;  %v314_v48 = vmul.f32 %v311_v43, %v294_v41  ;;  %v315_v49 = vmul.f32 %v311_v43, %v295_v42  ;;  %v316_v57 = vmul.f32 %v311_v43, %v296_v53 }
 0x301   :  { %v321_v22 = vadd.f32 %v759_v45, %v313_v47  ;;  %v322_v52 = vadd.f32 %v759_v45, %v314_v48  ;;  %v323_v24 = vadd.f32 %v759_v45, %v315_v49  ;;  %v324_v8 = vadd.f32 %v759_v45, %v316_v57 }
 0x303   :  { %v325_v55 = vmax.f32 %v321_v22, 0.0  ;;  %v326_v56 = vmax.f32 %v322_v52, 0.0  ;;  %v327_v62 = vmax.f32 %v323_v24, 0.0  ;;  %v328_v5 = vmax.f32 %v324_v8, 0.0 }
 0x305   :  { %v349_v58 = vrot.slane %v325_v55, 1  ;;  %458 = vmatmul.f32.vlgmr.msra.gmra.mxu3 %v325_v55  ;;  %v333_v59 = vrot.slane %v325_v55, 7  ;;  %v350_v61 = vrot.slane %v326_v56, 1  ;;  %v334_v1 = vrot.slane %v326_v56, 7 }
 0x306   :  { %v352_v7 = vrot.slane %v327_v62, 1  ;;  %v336_v2 = vrot.slane %v327_v62, 7  ;;  %v354_v15 = vrot.slane %v328_v5, 1  ;;  %v338_v18 = vrot.slane %v328_v5, 7 }
 0x307   :  { %v344_v34 = vsel %vm57_vm0, 0.0, %v333_v59  ;;  %v351_v63 = vsel %vm94_vm2, %v349_v58, %v350_v61  ;;  %v335_v10 = vsel %vm57_vm0, %v333_v59, %v334_v1 }
 0x308   :  { %v345_v0 = vmul.f32 %v344_v34, %v966_v40  ;;  %v361_v4 = vmul.f32 %v351_v63, %v975_v50  ;;  %v353_v11 = vsel %vm94_vm2, %v350_v61, %v352_v7  ;;  %v346_v12 = vmul.f32 %v335_v10, %v977_v51 }
 0x309   :  { %v362_v14 = vmul.f32 %v353_v11, %v963_v38  ;;  %v337_v40 = vsel %vm57_vm0, %v334_v1, %v336_v2  ;;  %v355_v50 = vsel %vm94_vm2, %v352_v7, %v354_v15  ;;  %v339_v51 = vsel %vm57_vm0, %v336_v2, %v338_v18 }
 0x30a   :  { %429 = vmatmul.f32.vlgmr.msra.gmra.mxu2 %v345_v0  ;;  %487 = vmatmul.f32.vlgmr.msrb.gmra.mxu1 %v361_v4  ;;  %v347_v16 = vmul.f32 %v337_v40, %v987_v60  ;;  %v363_v17 = vmul.f32 %v355_v50, %v995_v3  ;;  %v360_v38 = vsel %vm94_vm2, %v354_v15, 0.0  ;;  %v348_v20 = vmul.f32 %v339_v51, %v999_v6 }
 0x30b   :  { %v364_v21 = vmul.f32 %v360_v38, %v1006_v13 }
 0x30d   :  { %461 = vmatmul.f32.gmra.mxu3 %v326_v56 }
 0x312   :  { %432 = vmatmul.f32.gmra.mxu2 %v346_v12  ;;  %490 = vmatmul.f32.gmra.mxu1 %v362_v14 }
 0x315   :  { %464 = vmatmul.f32.gmra.mxu3 %v327_v62 }
 0x31a   :  { %435 = vmatmul.f32.gmra.mxu2 %v347_v16  ;;  %493 = vmatmul.f32.gmra.mxu1 %v363_v17 }
 0x31d   :  { %467 = vmatmul.f32.gmra.mxu3 %v328_v5 }
 0x322   :  { %438 = vmatmul.f32.gmra.mxu2 %v348_v20  ;;  %496 = vmatmul.f32.gmra.mxu1 %v364_v21 }
 0x325   :  { %734 = vmatmul.msk.f32.vlgmr.msrb.gmra.mxu3 %vm143_vm1, %v928_v26 }
 0x32a   :  { %732 = vmatmul.msk.f32.vlgmr.msrb.gmra.mxu2 %vm143_vm1, %v869_v9 }
 0x332   :  { %733 = vmatmul.msk.f32.gmra.mxu2 %vm143_vm1, %v903_v19 }
 0x367   :  { %v1270_v23 = vpop.f32.mrf.mxu0 }
 0x368   :  { %v649_v58 = vmul.f32 %v1270_v23, %v1270_v23 }
 0x387   :  { %v488_v3 = vpop.f32.mrf.mxu1 }
 0x388   :  { %v459_v60 = vpop.f32.mrf.mxu3 }
 0x38d   :  { %v430_v25 = vpop.f32.mrf.mxu2 }
 0x38e   :  { %v460_v32 = vadd.f32 %v459_v60, %v430_v25 }
 0x38f   :  { %v491_v28 = vpop.f32.mrf.mxu1 }
 0x390   :  { %v462_v27 = vpop.f32.mrf.mxu3  ;;  %v1250_v26 = vadd.f32 %v488_v3, %v460_v32 }
 0x392   :  { %v521_v39 = vmul.f32 %v1250_v26, %v1250_v26 }
 0x395   :  { %v433_v29 = vpop.f32.mrf.mxu2 }
 0x396   :  { %v463_v30 = vadd.f32 %v462_v27, %v433_v29 }
 0x397   :  { %v494_v13 = vpop.f32.mrf.mxu1 }
 0x398   :  { %v465_v6 = vpop.f32.mrf.mxu3  ;;  %v1248_v35 = vadd.f32 %v491_v28, %v463_v30 }
 0x39a   :  { %v522_v19 = vmul.f32 %v1248_v35, %v1248_v35  ;;  %v500_v41 = vadd.f32 %v1248_v35, %v1250_v26 }
 0x39c   :  { %v525_v45 = vadd.f32 %v522_v19, %v521_v39 }
 0x39d   :  { %v436_v31 = vpop.f32.mrf.mxu2 }
 0x39e   :  { %v466_v33 = vadd.f32 %v465_v6, %v436_v31 }
 0x39f   :  { %v497_v44 = vpop.f32.mrf.mxu1 }
 0x3a0   :  { %v1252_v9 = vadd.f32 %v494_v13, %v466_v33  ;;  %v468_v36 = vpop.f32.mrf.mxu3 }
 0x3a2   :  { %v523_v42 = vmul.f32 %v1252_v9, %v1252_v9  ;;  %v501_v46 = vadd.f32 %v500_v41, %v1252_v9 }
 0x3a4   :  { %v526_v48 = vadd.f32 %v525_v45, %v523_v42 }
 0x3a5   :  { %v439_v37 = vpop.f32.mrf.mxu2 }
 0x3a6   :  { %v469_v43 = vadd.f32 %v468_v36, %v439_v37 }
 0x3a8   :  { %v1263_v47 = vadd.f32 %v497_v44, %v469_v43  ;;  %v1276_v61 = vpop.f32.mrf.mxu3 }
 0x3a9   :  { %v652_v8 = vmul.f32 %v1276_v61, %v1276_v61 }
 0x3aa   :  { %v502_v49 = vadd.f32 %v501_v46, %v1263_v47  ;;  %v524_v22 = vmul.f32 %v1263_v47, %v1263_v47 }
 0x3ac   :  { %v503_v52 = vrot.slane %v502_v49, 4  ;;  %v527_v24 = vadd.f32 %v526_v48, %v524_v22 }
 0x3ad   :  { %v1268_v53 = vpop.f32.mrf.mxu2 }
 0x3ae   :  { %v504_v54 = vadd.f32 %v503_v52, %v502_v49  ;;  %v528_v55 = vrot.slane %v527_v24, 4  ;;  %v650_v59 = vmul.f32 %v1268_v53, %v1268_v53  ;;  %v628_v63 = vadd.f32 %v1268_v53, %v1270_v23 }
 0x3b0   :  { %v505_v56 = vrot.slane %v504_v54, 2  ;;  %v529_v57 = vadd.f32 %v528_v55, %v527_v24  ;;  %v653_v1 = vadd.f32 %v650_v59, %v649_v58 }
 0x3b2   :  { %v506_v62 = vadd.f32 %v505_v56, %v504_v54  ;;  %v530_v34 = vrot.slane %v529_v57, 2 }
 0x3b4   :  { %v507_v0 = vrot.slane %v506_v62, 1  ;;  %v531_v4 = vadd.f32 %v530_v34, %v529_v57 }
 0x3b5   :  { %v1280_v7 = vpop.f32.mrf.mxu2 }
 0x3b6   :  { %v629_v10 = vadd.f32 %v628_v63, %v1280_v7  ;;  %v651_v11 = vmul.f32 %v1280_v7, %v1280_v7  ;;  %v508_v5 = vadd.f32 %v507_v0, %v506_v62  ;;  %v532_v12 = vrot.slane %v531_v4, 1 }
 0x3b8   :  { %v654_v14 = vadd.f32 %v653_v1, %v651_v11  ;;  %v630_v2 = vadd.f32 %v629_v10, %v1276_v61  ;;  %509 = vrot.lane.b32.xlu2 %v508_v5, %s770_s3  ;;  %v533_v15 = vadd.f32 %v532_v12, %v531_v4 }
 0x3ba   :  { %v631_v40 = vrot.slane %v630_v2, 4  ;;  %v655_v50 = vadd.f32 %v654_v14, %v652_v8  ;;  %534 = vrot.lane.b32.xlu1 %v533_v15, %s770_s3 }
 0x3bc   :  { %v632_v16 = vadd.f32 %v631_v40, %v630_v2  ;;  %v656_v17 = vrot.slane %v655_v50, 4 }
 0x3be   :  { %v633_v18 = vrot.slane %v632_v16, 2  ;;  %v657_v51 = vadd.f32 %v656_v17, %v655_v50 }
 0x3c0   :  { %v634_v38 = vadd.f32 %v633_v18, %v632_v16  ;;  %v658_v20 = vrot.slane %v657_v51, 2 }
 0x3c2   :  { %v635_v21 = vrot.slane %v634_v38, 1  ;;  %v659_v60 = vadd.f32 %v658_v20, %v657_v51  ;;  %v555_v20 = vld [vmem:[%s1346_s7] sm:$0x1] }
 0x3c4   :  { %v636_v3 = vadd.f32 %v635_v21, %v634_v38  ;;  %v660_v25 = vrot.slane %v659_v60, 1 }
 0x3c6   :  { %637 = vrot.lane.b32.xlu0 %v636_v3, %s770_s3  ;;  %v661_v27 = vadd.f32 %v660_v25, %v659_v60 }
 0x3c8   :  { %662 = vrot.lane.b32.xlu2 %v661_v27, %s770_s3 }
 0x412   :  { %v510_v28 = vpop.permute.xlu2 %509 }
 0x413   :  { %v511_v29 = vadd.f32 %v510_v28, %v508_v5 }
 0x415   :  { %512 = vrot.lane.b32.xlu0 %v511_v29, %s771_s22 }
 0x422   :  { %v663_v6 = vpop.permute.xlu2 %662 }
 0x423   :  { %v664_v30 = vadd.f32 %v663_v6, %v661_v27 }
 0x425   :  { %665 = vrot.lane.b32.xlu0 %v664_v30, %s771_s22 }
 0x42c   :  { %v535_v13 = vpop.permute.xlu1 %534 }
 0x42d   :  { %v536_v31 = vadd.f32 %v535_v13, %v533_v15 }
 0x42f   :  { %537 = vrot.lane.b32.xlu2 %v536_v31, %s771_s22 }
 0x438   :  { %v638_v32 = vpop.permute.xlu0 %637 }
 0x439   :  { %v639_v33 = vadd.f32 %v638_v32, %v636_v3 }
 0x43b   :  { %640 = vrot.lane.b32.xlu1 %v639_v33, %s771_s22 }
 0x487   :  { %v513_v19 = vpop.permute.xlu0 %512 }
 0x488   :  { %v514_v36 = vadd.f32 %v513_v19, %v511_v29 }
 0x489   :  { %v538_v37 = vpop.permute.xlu2 %537 }
 0x48a   :  { %v539_v39 = vadd.f32 %v538_v37, %v536_v31  ;;  %515 = vrot.lane.b32.xlu1 %v514_v36, %s772_s23 }
 0x48c   :  { %540 = vrot.lane.b32.xlu0 %v539_v39, %s772_s23 }
 0x497   :  { %v666_v41 = vpop.permute.xlu0 %665 }
 0x498   :  { %v667_v42 = vadd.f32 %v666_v41, %v664_v30  ;;  %v683_v30 = vld [vmem:[%s1347_s10] sm:$0x1] }
 0x49a   :  { %668 = vrot.lane.b32.xlu1 %v667_v42, %s772_s23 }
 0x4ad   :  { %v641_v43 = vpop.permute.xlu1 %640 }
 0x4ae   :  { %v642_v44 = vadd.f32 %v641_v43, %v639_v33 }
 0x4b0   :  { %643 = vrot.lane.b32.xlu2 %v642_v44, %s772_s23 }
 0x4fc   :  { %v516_v45 = vpop.permute.xlu1 %515 }
 0x4fd   :  { %v517_v46 = vadd.f32 %v516_v45, %v514_v36  ;;  %v760_v45 = vld [vmem:[%s1344_s8] ss:$0 sm:$0xff] }
 0x4fe   :  { %v541_v48 = vpop.permute.xlu0 %540 }
 0x4ff   :  { %v542_v49 = vadd.f32 %v541_v48, %v539_v39  ;;  %518 = vrot.lane.b32.xlu2 %v517_v46, %s769_s25 }
 0x501   :  { %543 = vrot.lane.b32.xlu1 %v542_v49, %s769_s25 }
 0x50a   :  { %v644_v22 = vpop.permute.xlu2 %643 }
 0x50b   :  { %v645_v52 = vadd.f32 %v644_v22, %v642_v44 }
 0x50c   :  { %v669_v24 = vpop.permute.xlu1 %668 }
 0x50d   :  { %v670_v54 = vadd.f32 %v669_v24, %v667_v42  ;;  %646 = vrot.lane.b32.xlu0 %v645_v52, %s769_s25 }
 0x50f   :  { %671 = vrot.lane.b32.xlu2 %v670_v54, %s769_s25 }
 0x559   :  { %v519_v55 = vpop.permute.xlu2 %518 }
 0x55a   :  { %v520_v56 = vadd.f32 %v519_v55, %v517_v46 }
 0x55c   :  { %v546_v57 = vmul.f32 0.001953125, %v520_v56 }
 0x55e   :  { %v548_v62 = vmul.f32 %v546_v57, %v546_v57  ;;  %v550_v27 = vperm.slane %v546_v57, 0 }
 0x560   :  { %v551_v31 = vsub.f32 %v1250_v26, %v550_v27  ;;  %v552_v32 = vsub.f32 %v1248_v35, %v550_v27  ;;  %v553_v33 = vsub.f32 %v1252_v9, %v550_v27  ;;  %v554_v19 = vsub.f32 %v1263_v47, %v550_v27  ;;  %v761_v35 = vld [vmem:[%s1345_s11] ss:$0 sm:$0xff] }
 0x569   :  { %v672_v4 = vpop.permute.xlu2 %671 }
 0x56a   :  { %v673_v8 = vadd.f32 %v672_v4, %v670_v54 }
 0x56c   :  { %v675_v14 = vmul.f32 0.001953125, %v673_v8 }
 0x573   :  { %v544_v58 = vpop.permute.xlu1 %543 }
 0x574   :  { %v545_v59 = vadd.f32 %v544_v58, %v542_v49 }
 0x576   :  { %v547_v34 = vmul.f32 0.001953125, %v545_v59 }
 0x578   :  { %v549_v63 = vsub.f32 %v547_v34, %v548_v62 }
 0x57a   :  { %v556_v0 = vadd.f32 1e-05, %v549_v63 }
 0x57c   :  { %764 = vrsqrt.f32 %v556_v0  ;;  %vm563_vm7 = vweird.f32 %v556_v0 }
 0x57f   :  { %v647_v1 = vpop.permute.xlu0 %646 }
 0x580   :  { %v648_v10 = vadd.f32 %v647_v1, %v645_v52 }
 0x582   :  { %v765_v11 = vpop.eup %764  ;;  %v674_v5 = vmul.f32 0.001953125, %v648_v10 }
 0x583   :  { %v558_v12 = vmul.f32 %v765_v11, %v556_v0  ;;  %vm564_vm6 = vweird.f32 %v765_v11 }
 0x584   :  { %v676_v2 = vmul.f32 %v674_v5, %v674_v5  ;;  %vm565_vm8 = vmor %vm563_vm7, %vm564_vm6  ;;  %v678_v29 = vperm.slane %v674_v5, 0 }
 0x585   :  { %v559_v15 = vmul.f32 %v765_v11, %v558_v12 }
 0x586   :  { %v677_v40 = vsub.f32 %v675_v14, %v676_v2  ;;  %v679_v37 = vsub.f32 %v1270_v23, %v678_v29  ;;  %v680_v26 = vsub.f32 %v1268_v53, %v678_v29  ;;  %v681_v9 = vsub.f32 %v1280_v7, %v678_v29 }
 0x587   :  { %v560_v50 = vmul.f32 0.5, %v559_v15  ;;  %v682_v47 = vsub.f32 %v1276_v61, %v678_v29 }
 0x588   :  { %v684_v16 = vadd.f32 1e-05, %v677_v40 }
 0x589   :  { %v561_v17 = vsub.f32 1.5, %v560_v50 }
 0x58a   :  { %766 = vrsqrt.f32 %v684_v16  ;;  %vm691_vm10 = vweird.f32 %v684_v16 }
 0x58b   :  { %v562_v18 = vmul.f32 %v765_v11, %v561_v17 }
 0x58d   :  { %v566_v21 = vsel %vm565_vm8, %v765_v11, %v562_v18 }
 0x58e   :  { %v567_v3 = vmul.f32 %v566_v21, %v555_v20 }
 0x590   :  { %v767_v51 = vpop.eup %766  ;;  %v569_v6 = vperm.slane %v567_v3, 0 }
 0x591   :  { %v686_v38 = vmul.f32 %v767_v51, %v684_v16  ;;  %vm692_vm9 = vweird.f32 %v767_v51 }
 0x592   :  { %vm693_vm11 = vmor %vm691_vm10, %vm692_vm9  ;;  %v571_v41 = vmul.f32 %v569_v6, %v551_v31  ;;  %v572_v42 = vmul.f32 %v569_v6, %v552_v32  ;;  %v573_v43 = vmul.f32 %v569_v6, %v553_v33  ;;  %v574_v44 = vmul.f32 %v569_v6, %v554_v19 }
 0x593   :  { %v687_v60 = vmul.f32 %v767_v51, %v686_v38 }
 0x594   :  { %v579_v52 = vadd.f32 %v760_v45, %v571_v41  ;;  %v580_v24 = vadd.f32 %v760_v45, %v572_v42  ;;  %v581_v54 = vadd.f32 %v760_v45, %v573_v43  ;;  %v582_v55 = vadd.f32 %v760_v45, %v574_v44 }
 0x595   :  { %v688_v25 = vmul.f32 0.5, %v687_v60 }
 0x597   :  { %v689_v28 = vsub.f32 1.5, %v688_v25 }
 0x599   :  { %v690_v13 = vmul.f32 %v767_v51, %v689_v28 }
 0x59b   :  { %v694_v36 = vsel %vm693_vm11, %v767_v51, %v690_v13 }
 0x59c   :  { %v695_v39 = vmul.f32 %v694_v36, %v683_v30 }
 0x59e   :  { %v697_v23 = vperm.slane %v695_v39, 0 }
 0x5a0   :  { %v699_v46 = vmul.f32 %v697_v23, %v679_v37  ;;  %v700_v48 = vmul.f32 %v697_v23, %v680_v26  ;;  %v701_v49 = vmul.f32 %v697_v23, %v681_v9  ;;  %v702_v22 = vmul.f32 %v697_v23, %v682_v47 }
 0x5a2   :  { %v707_v56 = vadd.f32 %v761_v35, %v699_v46  ;;  %v708_v57 = vadd.f32 %v761_v35, %v700_v48  ;;  %v709_v58 = vadd.f32 %v761_v35, %v701_v49  ;;  %v710_v59 = vadd.f32 %v761_v35, %v702_v22 }
 0x5a4   :  { %v711_v62 = vadd.f32 %v707_v56, %v579_v52  ;;  %v712_v34 = vadd.f32 %v708_v57, %v580_v24  ;;  %v713_v53 = vadd.f32 %v709_v58, %v581_v54  ;;  %v714_v63 = vadd.f32 %v710_v59, %v582_v55 }
 0x5a6   :  { %v715_v7 = vmax.f32 %v711_v62, 0.0  ;;  %v716_v0 = vmax.f32 %v712_v34, 0.0  ;;  %v717_v61 = vmax.f32 %v713_v53, 0.0  ;;  %v718_v4 = vmax.f32 %v714_v63, 0.0 }
 0x5a8   :  { %719 = vst [vmem:[%s1348_s12] sm:$0xff] %v715_v7 }
 0x5a9   :  { %720 = vst [vmem:[%s1348_s12 + $0x8] sm:$0xff] %v716_v0 }
 0x5aa   :  { %721 = vst [vmem:[%s1348_s12 + $0x10] sm:$0xff] %v717_v61 }
 0x5ab   :  { %722 = vst [vmem:[%s1348_s12 + $0x18] sm:$0xff] %v718_v4 }

</bundles_post_ra>
